<compile_context>
chip_gen: v7x
topology: tpu7x:2x2x1
jax: 0.10.0
libtpu: 0.0.40
codegen_flags: <defaults>
</compile_context>

<pallas_src>
import jax
import jax.numpy as jnp
from jax.experimental import pallas as pl
from jax.experimental.pallas import tpu as pltpu

N_STATES = 3
N_ACTIONS = 1
IN_DIM = N_STATES + N_ACTIONS   # 4
IN_PAD = 8                      # sublane-aligned packed-input rows
H = 30                          # hidden width
H_PAD = 32                      # sublane-aligned hidden width
LANE = 128


def _round_up(x, m):
    return ((x + m - 1) // m) * m


def _num_tensorcores():
    # Best-effort query of TensorCores per device (2 on v7x, 1 on v5e/v6e).
    try:
        n = int(getattr(jax.devices()[0], "num_cores", 1) or 1)
        return min(max(n, 1), 2)
    except Exception:
        return 1


def critic_kernel(x_ref, w1_ref, b1_ref, w2_ref, b2_ref, w3_ref, b3_ref, o_ref):
    # Batch-on-lanes layout:
    #   x_ref : [IN_PAD, TB]     packed [state | action | 0]^T tile (pipelined)
    #   w1_ref: [H_PAD, IN_PAD]  W1^T, zero-padded       (VMEM-resident)
    #   b1_ref: [H_PAD, 1]
    #   w2_ref: [H_PAD, H_PAD]   W2^T, zero-padded       (VMEM-resident)
    #   b2_ref: [H_PAD, 1]
    #   w3_ref: [H_PAD, 1]       W3 column, zero-padded  (VMEM-resident)
    #   b3_ref: [1, 1]           scalar in SMEM
    #   o_ref : [1, TB]          lane-dense q^T tile
    x = x_ref[...]

    # Layer 1: h1^T = relu(W1^T @ x^T + b1).  K=8, N=TB lanes.
    h1 = jnp.dot(w1_ref[...], x, preferred_element_type=jnp.float32) + b1_ref[...]
    h1 = jnp.maximum(h1, 0.0)                                   # [H_PAD, TB]

    # Layer 2: weight-stationary [32,32] @ [32,TB] -> full MXU columns.
    h2 = jnp.dot(w2_ref[...], h1, preferred_element_type=jnp.float32) + b2_ref[...]
    h2 = jnp.maximum(h2, 0.0)                                   # [H_PAD, TB]

    # Layer 3 (30 -> 1): VPU multiply + cross-sublane reduce -> lane-dense row.
    q = jnp.sum(h2 * w3_ref[...], axis=0, keepdims=True) + b3_ref[0, 0]
    o_ref[...] = q.astype(o_ref.dtype)                          # [1, TB]


def critic_forward(state, action, params, *, max_tb=4096):
    """state: [B, N_STATES], action: [B, N_ACTIONS] -> q: [B, 1]"""
    w1, b1, w2, b2, w3, b3 = params
    state = state.astype(jnp.float32)
    action = action.astype(jnp.float32)
    B = state.shape[0]

    # Tile the batch along the lane axis.  grid=1 on single-TC chips; two
    # balanced steps on dual-TC chips (sharded via "parallel").
    num_cores = _num_tensorcores()
    tb = _round_up(pl.cdiv(B, num_cores), LANE)
    tb = min(tb, max_tb)
    b_pad = _round_up(B, tb)
    grid = (b_pad // tb,)

    # Pack [state | action], transpose once in the wrapper (negligible HBM
    # traffic), zero-pad to IN_PAD feature rows and b_pad batch lanes.
    x = jnp.concatenate([state, action], axis=1)                  # [B, 4]
    xT = jnp.pad(x, ((0, b_pad - B), (0, IN_PAD - IN_DIM))).T     # [8, b_pad]

    # Transposed, zero-padded weights for the y^T = W^T @ x^T orientation.
    w1T = jnp.pad(w1.T, ((0, H_PAD - H), (0, IN_PAD - IN_DIM)))   # [32, 8]
    b1c = jnp.pad(b1.reshape(H, 1), ((0, H_PAD - H), (0, 0)))     # [32, 1]
    w2T = jnp.pad(w2.T, ((0, H_PAD - H), (0, H_PAD - H)))         # [32, 32]
    b2c = jnp.pad(b2.reshape(H, 1), ((0, H_PAD - H), (0, 0)))     # [32, 1]
    w3c = jnp.pad(w3, ((0, H_PAD - H), (0, 0)))                   # [32, 1]
    b3s = b3.reshape(1, 1)

    const = lambda arr: pl.BlockSpec(arr.shape, lambda i: (0, 0))

    out = pl.pallas_call(
        critic_kernel,
        out_shape=jax.ShapeDtypeStruct((1, b_pad), jnp.float32),
        grid=grid,
        in_specs=[
            pl.BlockSpec((IN_PAD, tb), lambda i: (0, i)),         # x^T tile
            const(w1T),
            const(b1c),
            const(w2T),
            const(b2c),
            const(w3c),
            pl.BlockSpec(memory_space=pltpu.MemorySpace.SMEM),    # b3 scalar
        ],
        out_specs=pl.BlockSpec((1, tb), lambda i: (0, i)),        # lane-dense q^T
        compiler_params=pltpu.CompilerParams(
            dimension_semantics=("parallel",),
        ),
    )(xT, w1T, b1c, w2T, b2c, w3c, b3s)

    return out[:, :B].T   # [B, 1]


def init_params(key):
    """Match weights_init: Linear weights ~ N(0, 0.1), biases = 0."""
    k1, k2, k3 = jax.random.split(key, 3)
    w1 = 0.1 * jax.random.normal(k1, (IN_DIM, H), dtype=jnp.float32)
    b1 = jnp.zeros((1, H), dtype=jnp.float32)
    w2 = 0.1 * jax.random.normal(k2, (H, H), dtype=jnp.float32)
    b2 = jnp.zeros((1, H), dtype=jnp.float32)
    w3 = 0.1 * jax.random.normal(k3, (H, 1), dtype=jnp.float32)
    b3 = jnp.zeros((1, 1), dtype=jnp.float32)
    return (w1, b1, w2, b2, w3, b3)


def critic_ref(state, action, params):
    """Pure-JAX reference for correctness check."""
    w1, b1, w2, b2, w3, b3 = params
    x = jnp.concatenate([state, action], axis=1)
    h1 = jnp.maximum(x @ w1 + b1, 0.0)
    h2 = jnp.maximum(h1 @ w2 + b2, 0.0)
    return h2 @ w3 + b3


if __name__ == "__main__":
    key = jax.random.PRNGKey(0)
    kp, ks, ka = jax.random.split(key, 3)

    params = init_params(kp)

    # Small inference-style batch.
    B = 2
    state = jax.random.normal(ks, (B, N_STATES), dtype=jnp.float32)
    action = jax.random.normal(ka, (B, N_ACTIONS), dtype=jnp.float32)

    q = jax.block_until_ready(critic_forward(state, action, params))
    q_ref = critic_ref(state, action, params)
    assert q.shape == (B, 1)
    assert jnp.allclose(q, q_ref, atol=1e-5, rtol=1e-5)

    # Training-sized batch, not a multiple of 128 (exercises lane padding and,
    # on dual-TensorCore chips, two balanced pipelined grid steps).
    B2 = 1234
    ks2, ka2 = jax.random.split(jax.random.PRNGKey(1))
    state2 = jax.random.normal(ks2, (B2, N_STATES), dtype=jnp.float32)
    action2 = jax.random.normal(ka2, (B2, N_ACTIONS), dtype=jnp.float32)
    q2 = jax.block_until_ready(critic_forward(state2, action2, params))
    q2_ref = critic_ref(state2, action2, params)
    assert q2.shape == (B2, 1)
    assert jnp.allclose(q2, q2_ref, atol=1e-4, rtol=1e-4)

    print("KERNEL_OK")
</pallas_src>

<mosaic_0001>
module attributes {stable_mosaic.version = 11 : i64} {
  func.func @critic_kernel(%arg0: i32, %arg1: memref<8x128xf32, #tpu.memory_space<vmem>>, %arg2: memref<32x8xf32, #tpu.memory_space<vmem>>, %arg3: memref<32x1xf32, #tpu.memory_space<vmem>>, %arg4: memref<32x32xf32, #tpu.memory_space<vmem>>, %arg5: memref<32x1xf32, #tpu.memory_space<vmem>>, %arg6: memref<32x1xf32, #tpu.memory_space<vmem>>, %arg7: memref<1x1xf32, #tpu.memory_space<smem>>, %arg8: memref<1x128xf32, #tpu.memory_space<vmem>>) attributes {dimension_semantics = [#tpu.dimension_semantics<parallel>], iteration_bounds = array<i64: 1>, scalar_prefetch = 0 : i64, scratch_operands = 0 : i64, tpu.core_type = #tpu.core_type<tc>, window_params = [{transform_indices = @transform_0, window_bounds = array<i64: 8, 128>}, {pipeline_mode = #tpu.pipeline_mode<synchronous>, transform_indices = @transform_1, window_bounds = array<i64: 32, 8>}, {pipeline_mode = #tpu.pipeline_mode<synchronous>, transform_indices = @transform_2, window_bounds = array<i64: 32, 1>}, {pipeline_mode = #tpu.pipeline_mode<synchronous>, transform_indices = @transform_3, window_bounds = array<i64: 32, 32>}, {pipeline_mode = #tpu.pipeline_mode<synchronous>, transform_indices = @transform_4, window_bounds = array<i64: 32, 1>}, {pipeline_mode = #tpu.pipeline_mode<synchronous>, transform_indices = @transform_5, window_bounds = array<i64: 32, 1>}, {transform_indices = @transform_6, window_bounds = array<i64: 1, 1>}, {transform_indices = @transform_7, window_bounds = array<i64: 1, 128>}]} {
    %c0 = arith.constant 0 : index
    %c0_0 = arith.constant 0 : index
    %0 = vector.load %arg1[%c0, %c0_0] : memref<8x128xf32, #tpu.memory_space<vmem>>, vector<8x128xf32>
    %c0_1 = arith.constant 0 : index
    %c0_2 = arith.constant 0 : index
    %1 = vector.load %arg2[%c0_1, %c0_2] : memref<32x8xf32, #tpu.memory_space<vmem>>, vector<32x8xf32>
    %cst = arith.constant dense<0.000000e+00> : vector<32x128xf32>
    %2 = tpu.matmul %1, %0, %cst {dimension_numbers = #tpu.dot_dimension_numbers<[1], [0], [0], [1], [0, 0, 1, 1], [], []>} : vector<32x8xf32>, vector<8x128xf32>, vector<32x128xf32> -> vector<32x128xf32>
    %c0_3 = arith.constant 0 : index
    %c0_4 = arith.constant 0 : index
    %3 = vector.load %arg3[%c0_3, %c0_4] : memref<32x1xf32, #tpu.memory_space<vmem>>, vector<32x1xf32>
    %4 = vector.broadcast %3 : vector<32x1xf32> to vector<32x128xf32>
    %5 = arith.addf %2, %4 : vector<32x128xf32>
    %cst_5 = arith.constant 0.000000e+00 : f32
    %6 = vector.broadcast %cst_5 : f32 to vector<32x128xf32>
    %7 = arith.maximumf %5, %6 : vector<32x128xf32>
    %c0_6 = arith.constant 0 : index
    %c0_7 = arith.constant 0 : index
    %8 = vector.load %arg4[%c0_6, %c0_7] : memref<32x32xf32, #tpu.memory_space<vmem>>, vector<32x32xf32>
    %cst_8 = arith.constant dense<0.000000e+00> : vector<32x128xf32>
    %9 = tpu.matmul %8, %7, %cst_8 {dimension_numbers = #tpu.dot_dimension_numbers<[1], [0], [0], [1], [0, 0, 1, 1], [], []>} : vector<32x32xf32>, vector<32x128xf32>, vector<32x128xf32> -> vector<32x128xf32>
    %c0_9 = arith.constant 0 : index
    %c0_10 = arith.constant 0 : index
    %10 = vector.load %arg5[%c0_9, %c0_10] : memref<32x1xf32, #tpu.memory_space<vmem>>, vector<32x1xf32>
    %11 = vector.broadcast %10 : vector<32x1xf32> to vector<32x128xf32>
    %12 = arith.addf %9, %11 : vector<32x128xf32>
    %cst_11 = arith.constant 0.000000e+00 : f32
    %13 = vector.broadcast %cst_11 : f32 to vector<32x128xf32>
    %14 = arith.maximumf %12, %13 : vector<32x128xf32>
    %c0_12 = arith.constant 0 : index
    %c0_13 = arith.constant 0 : index
    %15 = vector.load %arg6[%c0_12, %c0_13] : memref<32x1xf32, #tpu.memory_space<vmem>>, vector<32x1xf32>
    %16 = vector.broadcast %15 : vector<32x1xf32> to vector<32x128xf32>
    %17 = arith.mulf %14, %16 : vector<32x128xf32>
    %cst_14 = arith.constant dense<0.000000e+00> : vector<128xf32>
    %18 = vector.multi_reduction <add>, %17, %cst_14 [0] : vector<32x128xf32> to vector<128xf32>
    %19 = vector.shape_cast %18 : vector<128xf32> to vector<1x128xf32>
    %c0_15 = arith.constant 0 : index
    %c0_16 = arith.constant 0 : index
    %20 = memref.load %arg7[%c0_15, %c0_16] : memref<1x1xf32, #tpu.memory_space<smem>>
    %21 = vector.broadcast %20 : f32 to vector<1x128xf32>
    %22 = arith.addf %19, %21 : vector<1x128xf32>
    %c0_17 = arith.constant 0 : index
    %c0_18 = arith.constant 0 : index
    %23 = vector.load %arg8[%c0_17, %c0_18] : memref<1x128xf32, #tpu.memory_space<vmem>>, vector<1x128xf32>
    tpu.vector_store %arg8[%c0_17, %c0_18], %22 {strides = array<i32>} : memref<1x128xf32, #tpu.memory_space<vmem>>, vector<1x128xf32>,
    return
  }
  func.func @transform_0(%arg0: i32) -> (i32, i32) {
    %c0_i32 = arith.constant 0 : i32
    %c0_i32_0 = arith.constant 0 : i32
    return %c0_i32, %arg0 : i32, i32
  }
  func.func @transform_1(%arg0: i32) -> (i32, i32) {
    %c0_i32 = arith.constant 0 : i32
    %c0_i32_0 = arith.constant 0 : i32
    %c0_i32_1 = arith.constant 0 : i32
    return %c0_i32, %c0_i32_0 : i32, i32
  }
  func.func @transform_2(%arg0: i32) -> (i32, i32) {
    %c0_i32 = arith.constant 0 : i32
    %c0_i32_0 = arith.constant 0 : i32
    %c0_i32_1 = arith.constant 0 : i32
    return %c0_i32, %c0_i32_0 : i32, i32
  }
  func.func @transform_3(%arg0: i32) -> (i32, i32) {
    %c0_i32 = arith.constant 0 : i32
    %c0_i32_0 = arith.constant 0 : i32
    %c0_i32_1 = arith.constant 0 : i32
    return %c0_i32, %c0_i32_0 : i32, i32
  }
  func.func @transform_4(%arg0: i32) -> (i32, i32) {
    %c0_i32 = arith.constant 0 : i32
    %c0_i32_0 = arith.constant 0 : i32
    %c0_i32_1 = arith.constant 0 : i32
    return %c0_i32, %c0_i32_0 : i32, i32
  }
  func.func @transform_5(%arg0: i32) -> (i32, i32) {
    %c0_i32 = arith.constant 0 : i32
    %c0_i32_0 = arith.constant 0 : i32
    %c0_i32_1 = arith.constant 0 : i32
    return %c0_i32, %c0_i32_0 : i32, i32
  }
  func.func @transform_6(%arg0: i32) -> (i32, i32) {
    %c0_i32 = arith.constant 0 : i32
    %c0_i32_0 = arith.constant 0 : i32
    %c0_i32_1 = arith.constant 0 : i32
    return %c0_i32, %c0_i32_0 : i32, i32
  }
  func.func @transform_7(%arg0: i32) -> (i32, i32) {
    %c0_i32 = arith.constant 0 : i32
    %c0_i32_0 = arith.constant 0 : i32
    return %c0_i32, %arg0 : i32, i32
  }
}

</mosaic_0001>

<bundles_post_ra>
// kernel: tpu_custom_call.1
= control target key start
LH: loop header
LB: loop body
LE: loop exit
PB: predicated region body
PF: predicated region fallthrough
CT: control target
= control target key end

     0   :  { %vm57_vm0 = vcmask 64512   ;;  %v427_v5 = vmov 0   ;;  %s555_s0 = inlined_call_operand.vmem [shape: f32[8,128], index: 0, kind: input, shape index: {}]   ;;  %s556_s1 = inlined_call_operand.vmem [shape: f32[32,8], index: 1, kind: input, shape index: {}]   ;;  %s557_s2 = inlined_call_operand.vmem [shape: f32[32,1], index: 2, kind: input, shape index: {}]   ;;  %s558_s3 = inlined_call_operand.vmem [shape: f32[32,32], index: 3, kind: input, shape index: {}]   ;;  %s559_s4 = inlined_call_operand.vmem [shape: f32[32,1], index: 4, kind: input, shape index: {}]   ;;  %s560_s5 = inlined_call_operand.vmem [shape: f32[32,1], index: 5, kind: input, shape index: {}]   ;;  %s561_s6 = inlined_call_operand.<no memory space> [shape: f32[1,1], index: 6, kind: input, shape index: {}]   ;;  %s562_s7 = inlined_call_operand.hbm [shape: f32[1,128], index: 7, kind: output, shape index: {}]  }
   0x1   :  { %v28_v0 = vld [vmem:[%s555_s0] sm:$0xff]  ;;  %v30_v2 = vld [vmem:[%s556_s1 + $0x8] sm:$0xff]  ;;  %v31_v3 = vld [vmem:[%s556_s1 + $0x10] sm:$0xff]  ;;  %401 = vset.pattern.permute.xlu0 %v427_v5  ;;  %402 = vset.pattern.permute.xlu1 %v427_v5 }
   0x2   :  { %v29_v1 = vld [vmem:[%s556_s1] sm:$0xff]  ;;  %365 = vmatprep.subr.mxu0 %v28_v0  ;;  %v35_v6 = vld [vmem:[%s557_s2 + $0x10] sm:$0xff]  ;;  %v32_v7 = vld [vmem:[%s556_s1 + $0x18] sm:$0xff] }
   0x3   :  { %367 = vmatprep.mubr.msk.f32.mxu0 %vm57_vm0, %v29_v1  ;;  %v33_v4 = vld [vmem:[%s557_s2] sm:$0xff]  ;;  %366 = vmatpush3.msra.mxu0 %v28_v0  ;;  %v34_v8 = vld [vmem:[%s557_s2 + $0x8] sm:$0xff] }
   0x4   :  { %368 = vmatmul.mubr.msk.f32.vlgmr.msra.gmra.mrb[0].mxu0 %vm57_vm0, %v30_v2  ;;  %39 = vperm.xlu0 %401, %v33_v4  }
   0x5   :  { %370 = vmatprep.mubr.msk.f32.mxu0 %vm57_vm0, %v31_v3  ;;  %49 = vperm.xlu1 %402, %v35_v6  }
   0x6   :  { %13 = vsyncpa [#allocation4], 0  ;;  %v36_v9 = vld [vmem:[%s557_s2 + $0x18] sm:$0xff]  ;;  %v163_v10 = vld [vmem:[%s559_s4] sm:$0xff]  ;;  %vm187_vm1 = vcmask 261120   ;;  %s428_s15 = smov [#allocation3]  }
   0x7   :  { %v164_v11 = vld [vmem:[%s559_s4 + $0x8] sm:$0xff]  ;;  %v165_v12 = vld [vmem:[%s559_s4 + $0x10] sm:$0xff]  ;;  %v166_v13 = vld [vmem:[%s559_s4 + $0x18] sm:$0xff]  ;;  %s336_s16 = sshll.u32 %s428_s15, 4  ;;  %s337_s16 = int_to_ptr.vmem [resolvable:$true] %s336_s16 }
   0x8   :  { %371 = vmatmul.mubr.msk.f32.gmra.mrb[2].mxu0 %vm57_vm0, %v32_v7  ;;  %44 = vperm.xlu0 %401, %v34_v8   ;;  %v289_v14 = vld [vmem:[%s560_s5] sm:$0xff]  ;;  %v290_v15 = vld [vmem:[%s560_s5 + $0x8] sm:$0xff]  ;;  %v291_v16 = vld [vmem:[%s560_s5 + $0x10] sm:$0xff]  ;;  %v327_v8 = vstv %s561_s6  ;;  %s403_s17 = scalar_lea.vmem %s337_s16, 16  ;;  %s407_s18 = scalar_lea.vmem %s337_s16, 32 }
   0x9   :  { %54 = vperm.xlu1 %402, %v36_v9   ;;  %v292_v17 = vld [vmem:[%s560_s5 + $0x18] sm:$0xff]  ;;  %v159_v18 = vld [vmem:[%s558_s3] sm:$0xff]  ;;  %v161_v19 = vld [vmem:[%s558_s3 + $0x10] sm:$0xff]  ;;  %p404_p0 = scmp.ne.s32.totalorder %s337_s16, %s403_s17  ;;  %p408_p1 = scmp.lt.s32.totalorder %s337_s16, %s337_s16 }
   0xa   :  { %381 = vmatprep.mubr.msk.f32.mxu0 %vm187_vm1, %v159_v18  ;;  %384 = vmatprep.mubr.msk.f32.mxu1 %vm187_vm1, %v161_v19  ;;  %v160_v38 = vld [vmem:[%s558_s3 + $0x8] sm:$0xff]  ;;  %v162_v39 = vld [vmem:[%s558_s3 + $0x18] sm:$0xff]  ;;  %p409_p2 = scmp.lt.s32.totalorder %s407_s18, %s403_s17 }
   0xc   :  { %169 = vperm.xlu0 %401, %v163_v10   ;;  %p410_p3 = por %p409_p2, %p408_p1 }
   0xd   :  { %174 = vperm.xlu1 %402, %v164_v11  }
   0xe   :  { %p411_p4 = pnand %p410_p3, %p404_p0 }
  0x10   :  { %179 = vperm.xlu0 %401, %v165_v12  }
  0x11   :  { %184 = vperm.xlu1 %402, %v166_v13  }
  0x14   :  { %295 = vperm.xlu0 %401, %v289_v14  }
  0x15   :  { %300 = vperm.xlu1 %402, %v290_v15  }
  0x18   :  { %305 = vperm.xlu0 %401, %v291_v16  }
  0x19   :  { %310 = vperm.xlu1 %402, %v292_v17  }
  0x83   :  { %v40_v20 = vpop.permute.xlu0 %39 }
  0x84   :  { %v50_v21 = vpop.permute.xlu1 %49 }
  0x87   :  { %v45_v22 = vpop.permute.xlu0 %44 }
  0x88   :  { %v55_v28 = vpop.permute.xlu1 %54 }
  0x8b   :  { %v170_v40 = vpop.permute.xlu0 %169 }
  0x8c   :  { %v175_v41 = vpop.permute.xlu1 %174 }
  0x8f   :  { %v180_v42 = vpop.permute.xlu0 %179 }
  0x90   :  { %v185_v43 = vpop.permute.xlu1 %184 }
  0x93   :  { %v296_v44 = vpop.permute.xlu0 %295 }
  0x94   :  { %v301_v53 = vpop.permute.xlu1 %300 }
  0x97   :  { %v306_v60 = vpop.permute.xlu0 %305 }
  0x98   :  { %v311_v63 = vpop.permute.xlu1 %310 }
  0xd7   :  { %v369_v23 = vpop.f32.mrb[0].mxu0 }
  0xd8   :  { %v142_v24 = vadd.f32 %v369_v23, %v45_v22  ;;  %v136_v25 = vpop.f32.mrb[1].mxu0 }
  0xd9   :  { %v137_v26 = vadd.f32 %v136_v25, %v40_v20 }
  0xda   :  { %v156_v27 = vmax.f32 %v142_v24, 0.0 }
  0xdb   :  { %v155_v29 = vmax.f32 %v137_v26, 0.0  ;;  %v372_v30 = vpop.f32.mrb[2].mxu0 }
  0xdc   :  { %v152_v31 = vadd.f32 %v372_v30, %v55_v28  ;;  %v146_v32 = vpop.f32.mrb[3].mxu0 }
  0xdd   :  { %v387_v33 = vpack.c.bf16 %v156_v27, %v155_v29  ;;  %v147_v34 = vadd.f32 %v146_v32, %v50_v21 }
  0xde   :  { %v158_v35 = vmax.f32 %v152_v31, 0.0 }
  0xdf   :  { %v157_v36 = vmax.f32 %v147_v34, 0.0  ;;  %388 = vmatprep.subr.bf16.mxu0 %v387_v33  ;;  %395 = vmatprep.subr.bf16.mxu1 %v387_v33 }
  0xe0   :  { %390 = vmatpush3.bf16.msra.mxu0 %v387_v33  ;;  %397 = vmatpush3.bf16.msra.mxu1 %v387_v33 }
  0xe1   :  { %v391_v37 = vpack.c.bf16 %v158_v35, %v157_v36 }
  0xe3   :  { %392 = vmatprep.subr.bf16.mxu0 %v391_v37  ;;  %396 = vmatprep.subr.bf16.mxu1 %v391_v37 }
  0xe4   :  { %394 = vmatpush3.bf16.msra.mxu0 %v391_v37  ;;  %398 = vmatpush3.bf16.msra.mxu1 %v391_v37 }
  0xe7   :  { %382 = vmatmul.mubr.msk.f32.vlgmr.msra.gmra.mrb[4].mxu0 %vm187_vm1, %v160_v38  ;;  %385 = vmatmul.mubr.msk.f32.vlgmr.msra.gmra.mrb[0].mxu1 %vm187_vm1, %v162_v39 }
 0x1ba   :  { %v383_v45 = vpop.f32.mrb[4].mxu0  ;;  %v386_v46 = vpop.f32.mrb[0].mxu1 }
 0x1bb   :  { %v272_v47 = vadd.f32 %v383_v45, %v175_v41  ;;  %v266_v48 = vpop.f32.mrb[5].mxu0  ;;  %v276_v49 = vpop.f32.mrb[1].mxu1  ;;  %v282_v50 = vadd.f32 %v386_v46, %v185_v43 }
 0x1bc   :  { %v267_v51 = vadd.f32 %v266_v48, %v170_v40  ;;  %v277_v52 = vadd.f32 %v276_v49, %v180_v42 }
 0x1bd   :  { %v286_v54 = vmax.f32 %v272_v47, 0.0  ;;  %v288_v58 = vmax.f32 %v282_v50, 0.0 }
 0x1be   :  { %v285_v55 = vmax.f32 %v267_v51, 0.0  ;;  %v287_v56 = vmax.f32 %v277_v52, 0.0 }
 0x1bf   :  { %v314_v57 = vmul.f32 %v301_v53, %v286_v54  ;;  %v316_v0 = vmul.f32 %v311_v63, %v288_v58 }
 0x1c0   :  { %v313_v59 = vmul.f32 %v296_v44, %v285_v55  ;;  %v315_v62 = vmul.f32 %v306_v60, %v287_v56 }
 0x1c2   :  { %v317_v61 = vadd.f32 %v314_v57, %v313_v59 }
 0x1c4   :  { %v318_v1 = vadd.f32 %v317_v61, %v315_v62 }
 0x1c6   :  { %v319_v2 = vadd.f32 %v318_v1, %v316_v0 }
 0x1c8   :  { %v320_v3 = vrot.slane %v319_v2, 4 }
 0x1ca   :  { %v321_v4 = vadd.f32 %v320_v3, %v319_v2 }
 0x1cc   :  { %v322_v5 = vrot.slane %v321_v4, 2 }
 0x1ce   :  { %v323_v6 = vadd.f32 %v322_v5, %v321_v4 }
 0x1d0   :  { %v324_v7 = vrot.slane %v323_v6, 1 }
 0x1d2   :  { %v325_v9 = vadd.f32 %v324_v7, %v323_v6 }
 0x1d4   :  { %v328_v10 = vadd.f32 %v327_v8, %v325_v9 }
 0x1d6   :  { %329 = vst [vmem:[#allocation3] sm:$0x1] %v328_v10 }
 0x1d7   :  { %414 = shalt.err (!%p411_p4)
}
 0x1d8   :  { %s415_s20 = scalar_lea.hbm %s562_s7, 16 }
 0x1d9   :  { %p416_p5 = scmp.ne.s32.totalorder %s562_s7, %s415_s20  ;;  %p419_p6 = scmp.lt.u32.totalorder %s415_s20, %s562_s7 }
 0x1db   :  { %p421_p7 = pnand %p419_p6, %p416_p5 }
 0x1dd   :  { %424 = shalt.err (!%p421_p7)
}
 0x1de   :  { %339 = dma.vmem_to_hbm [thread:$0]  %s337_s16, 16, %s562_s7, [#allocation4]  }
 0x1df   :  { %425 = dma.done.wait [#allocation4], 16  }
 0x1e0   :  { %426 = vsyncadd [#allocation4], 4294967280 }
 0x1e1   :  { %343 = vsyncpa [#allocation4], 1 }

</bundles_post_ra>
